<compile_context>
chip_gen: v7x
topology: tpu7x:2x2x1
jax: 0.10.0
libtpu: 0.0.40
codegen_flags: <defaults>
</compile_context>

<pallas_src>
import jax
import jax.numpy as jnp
from jax.experimental import pallas as pl
from jax.experimental.pallas import tpu as pltpu


# ----------------------------------------------------------------------------
# Padding geometry (8-sublane aligned)
# ----------------------------------------------------------------------------
def _padded_dims(L, max_pad):
    """Front/back replication pad sizes and padded length, 8-aligned."""
    if max_pad == 0:
        return 0, 0, L
    front = ((max_pad + 7) // 8) * 8          # 8-aligned front pad
    back = max_pad
    total = front + L + back
    back += (-total) % 8                      # round total length to 8 sublanes
    return front, back, front + L + back


# ----------------------------------------------------------------------------
# VMEM footprint estimate and (batch, channel) tile selection
# ----------------------------------------------------------------------------
def _vmem_estimate(bt, ct, L, max_pad, itemsize):
    _, _, Lp = _padded_dims(L, max_pad)
    blk = bt * L * ct
    io = (2 + 4) * blk * itemsize             # input x2 + 2 outputs x2 (double buf)
    tmp = bt * ct * (Lp + 3 * L) * 4          # xp + ~3 live full-size f32 temporaries
    return io + tmp


def _pick_tiles(B, L, C, itemsize, max_pad, budget_bytes, min_steps=8):
    """Pick (batch_block, channel_block) under a VMEM budget, preferring
    enough grid steps for pipelining / megacore, then the largest block,
    then the widest (most HBM-contiguous) channel block."""
    ct_cands = sorted({C} | {m for m in range(128, C, 128) if C % m == 0})
    bt_cands = sorted(d for d in range(1, B + 1) if B % d == 0)
    feasible = [(bt, ct)
                for ct in ct_cands for bt in bt_cands
                if _vmem_estimate(bt, ct, L, max_pad, itemsize) <= budget_bytes]
    if not feasible:
        # TODO(synk): add an L-tiling grid axis with a max_pad halo for shapes
        # where even the smallest (1, L, ct) block exceeds the budget.
        return 1, min(ct_cands)

    def score(p):
        bt, ct = p
        steps = (B // bt) * (C // ct)
        return (min(steps, min_steps), bt * ct, ct)

    return max(feasible, key=score)


# ----------------------------------------------------------------------------
# Kernel body
# ----------------------------------------------------------------------------
def _make_kernel(kernel_sizes, bt, L, ct):
    ks = sorted(kernel_sizes)
    n_k = len(ks)
    max_pad = (ks[-1] - 1) // 2
    front_pad, back_pad, Lp = _padded_dims(L, max_pad)
    inv_nk = 1.0 / n_k

    def kernel(x_ref, sea_ref, mm_ref):
        x = x_ref[...]                                   # (bt, L, ct)
        xf = x.astype(jnp.float32)

        # Replication-pad the time (sublane) axis once, 8-aligned; every
        # smaller kernel's pad is a sub-slice of this buffer.
        if Lp > L:
            parts = []
            if front_pad > 0:
                parts.append(jnp.broadcast_to(xf[:, 0:1, :], (bt, front_pad, ct)))
            parts.append(xf)
            if back_pad > 0:
                parts.append(jnp.broadcast_to(xf[:, L - 1:L, :], (bt, back_pad, ct)))
            xp = jnp.concatenate(parts, axis=1)          # (bt, Lp, ct) f32
        else:
            xp = xf

        def window(o):                                   # length-L window at offset o
            return xp[:, o:o + L, :]

        # Incremental nested-window accumulation (kernel sizes ascending):
        # keep one running centered-window sum S; extend only the new edge rows
        # when moving to the next larger kernel.
        k0 = ks[0]
        p0 = (k0 - 1) // 2
        S = window(front_pad - p0)
        for j in range(1, k0):
            S = S + window(front_pad - p0 + j)
        mm_sum = S * (inv_nk / k0)                       # fold first k, no zero-init

        prev_pad = p0
        for k in ks[1:]:
            p = (k - 1) // 2
            for o in range(front_pad - p, front_pad - prev_pad):           # left ext
                S = S + window(o)
            for o in range(front_pad + prev_pad + 1, front_pad + p + 1):   # right ext
                S = S + window(o)
            mm_sum = mm_sum + S * (inv_nk / k)
            prev_pad = p

        mm_ref[...] = mm_sum.astype(mm_ref.dtype)
        # Re-read x from VMEM here instead of keeping xf alive across the loop.
        sea_ref[...] = (x_ref[...].astype(jnp.float32) - mm_sum).astype(sea_ref.dtype)

    return kernel


# ----------------------------------------------------------------------------
# Wrapper
# ----------------------------------------------------------------------------
def series_decomp_multi_forward(x, kernel_sizes, *, vmem_budget_bytes=14 << 20):
    """Pallas forward pass of series_decomp_multi.

    Args:
      x: (B, L, C) float array (batch, seq_len, channels).
      kernel_sizes: sequence of odd ints (moving-average window sizes).
      vmem_budget_bytes: per-grid-step VMEM footprint target used for tiling.
    Returns:
      (sea, moving_mean), each of shape (B, L, C).
    """
    kernel_sizes = tuple(int(k) for k in kernel_sizes)
    assert len(kernel_sizes) >= 1
    assert all(k >= 1 and k % 2 == 1 for k in kernel_sizes), (
        "series_decomp_multi needs odd kernel sizes so every decomposition "
        "keeps the input length (PyTorch would otherwise shape-error on x - mean)")
    B, L, C = x.shape
    itemsize = jnp.dtype(x.dtype).itemsize
    max_pad = (max(kernel_sizes) - 1) // 2

    bt, ct = _pick_tiles(B, L, C, itemsize, max_pad, vmem_budget_bytes)
    assert B % bt == 0 and C % ct == 0

    grid = (B // bt, C // ct)
    blk = (bt, L, ct)
    idx = lambda b, c: (b, 0, c)

    est = _vmem_estimate(bt, ct, L, max_pad, itemsize)
    vmem_limit = int(max(32 << 20, min(est + (8 << 20), 128 << 20)))

    kernel = _make_kernel(kernel_sizes, bt, L, ct)

    sea, moving_mean = pl.pallas_call(
        kernel,
        out_shape=(jax.ShapeDtypeStruct((B, L, C), x.dtype),
                   jax.ShapeDtypeStruct((B, L, C), x.dtype)),
        grid_spec=pltpu.PrefetchScalarGridSpec(
            num_scalar_prefetch=0,
            grid=grid,
            in_specs=[pl.BlockSpec(blk, idx)],
            out_specs=(pl.BlockSpec(blk, idx),
                       pl.BlockSpec(blk, idx)),
        ),
        compiler_params=pltpu.CompilerParams(
            dimension_semantics=("parallel", "parallel"),
            vmem_limit_bytes=vmem_limit),
    )(x)
    return sea, moving_mean


# ----------------------------------------------------------------------------
# Pure-JAX reference (mirrors the PyTorch module) for correctness checking
# ----------------------------------------------------------------------------
def _reference(x, kernel_sizes):
    B, L, C = x.shape
    mms, ress = [], []
    for k in kernel_sizes:
        pad = (k - 1) // 2
        front = jnp.repeat(x[:, 0:1, :], pad, axis=1)
        back = jnp.repeat(x[:, -1:, :], pad, axis=1)
        xp = jnp.concatenate([front, x, back], axis=1)         # (B, L+2*pad, C)
        windows = jnp.stack([xp[:, j:j + L, :] for j in range(k)], axis=0)
        mm = jnp.mean(windows, axis=0)                         # AvgPool1d(k, stride=1)
        mms.append(mm)
        ress.append(x - mm)
    sea = sum(ress) / len(ress)
    moving_mean = sum(mms) / len(mms)
    return sea, moving_mean


if __name__ == "__main__":
    key = jax.random.PRNGKey(0)

    # Small test consistent with the module layout: (batch, seq_len, channels)
    B, L, C = 2, 32, 32
    kernel_sizes = (5, 13)
    x = jax.random.normal(key, (B, L, C), dtype=jnp.float32)

    sea, moving_mean = series_decomp_multi_forward(x, kernel_sizes)
    sea = jax.block_until_ready(sea)
    moving_mean = jax.block_until_ready(moving_mean)

    sea_ref, mm_ref = _reference(x, kernel_sizes)
    assert sea.shape == sea_ref.shape == (B, L, C)
    assert moving_mean.shape == mm_ref.shape == (B, L, C)
    assert jnp.allclose(moving_mean, mm_ref, atol=1e-5, rtol=1e-5)
    assert jnp.allclose(sea, sea_ref, atol=1e-5, rtol=1e-5)

    # Second config exercising the channel-tiling (lane-dense 128-wide blocks)
    # path used when B is small and C is large.
    B2, L2, C2 = 2, 48, 256
    ks2 = (3, 7, 11)
    x2 = jax.random.normal(jax.random.PRNGKey(1), (B2, L2, C2), dtype=jnp.float32)
    sea2, mm2 = series_decomp_multi_forward(x2, ks2)
    sea2 = jax.block_until_ready(sea2)
    mm2 = jax.block_until_ready(mm2)
    sea2_ref, mm2_ref = _reference(x2, ks2)
    assert jnp.allclose(mm2, mm2_ref, atol=1e-5, rtol=1e-5)
    assert jnp.allclose(sea2, sea2_ref, atol=1e-5, rtol=1e-5)

    print("KERNEL_OK")
</pallas_src>

<mosaic_0001>
module attributes {stable_mosaic.version = 11 : i64} {
  func.func @kernel(%arg0: i32, %arg1: i32, %arg2: memref<1x32x32xf32, #tpu.memory_space<vmem>>, %arg3: memref<1x32x32xf32, #tpu.memory_space<vmem>>, %arg4: memref<1x32x32xf32, #tpu.memory_space<vmem>>) attributes {dimension_semantics = [#tpu.dimension_semantics<parallel>, #tpu.dimension_semantics<parallel>], iteration_bounds = array<i64: 2, 1>, scalar_prefetch = 0 : i64, scratch_operands = 0 : i64, tpu.core_type = #tpu.core_type<tc>, window_params = [{transform_indices = @transform_0, window_bounds = array<i64: 1, 32, 32>}, {transform_indices = @transform_1, window_bounds = array<i64: 1, 32, 32>}, {transform_indices = @transform_2, window_bounds = array<i64: 1, 32, 32>}]} {
    %c0 = arith.constant 0 : index
    %c0_0 = arith.constant 0 : index
    %c0_1 = arith.constant 0 : index
    %0 = vector.load %arg2[%c0, %c0_0, %c0_1] : memref<1x32x32xf32, #tpu.memory_space<vmem>>, vector<1x32x32xf32>
    %1 = vector.extract_strided_slice %0 {offsets = [0, 0, 0], sizes = [1, 1, 32], strides = [1, 1, 1]} : vector<1x32x32xf32> to vector<1x1x32xf32>
    %2 = vector.shape_cast %1 : vector<1x1x32xf32> to vector<1x1x32xf32>
    %3 = vector.broadcast %2 : vector<1x1x32xf32> to vector<1x8x32xf32>
    %4 = vector.extract_strided_slice %0 {offsets = [0, 31, 0], sizes = [1, 1, 32], strides = [1, 1, 1]} : vector<1x32x32xf32> to vector<1x1x32xf32>
    %5 = vector.shape_cast %4 : vector<1x1x32xf32> to vector<1x1x32xf32>
    %6 = vector.broadcast %5 : vector<1x1x32xf32> to vector<1x8x32xf32>
    %7 = tpu.concatenate %3, %0, %6 in 1 : vector<1x8x32xf32>, vector<1x32x32xf32>, vector<1x8x32xf32> -> vector<1x48x32xf32>
    %8 = vector.extract_strided_slice %7 {offsets = [0, 6, 0], sizes = [1, 32, 32], strides = [1, 1, 1]} : vector<1x48x32xf32> to vector<1x32x32xf32>
    %9 = vector.extract_strided_slice %7 {offsets = [0, 7, 0], sizes = [1, 32, 32], strides = [1, 1, 1]} : vector<1x48x32xf32> to vector<1x32x32xf32>
    %10 = arith.addf %8, %9 : vector<1x32x32xf32>
    %11 = vector.extract_strided_slice %7 {offsets = [0, 8, 0], sizes = [1, 32, 32], strides = [1, 1, 1]} : vector<1x48x32xf32> to vector<1x32x32xf32>
    %12 = arith.addf %10, %11 : vector<1x32x32xf32>
    %13 = vector.extract_strided_slice %7 {offsets = [0, 9, 0], sizes = [1, 32, 32], strides = [1, 1, 1]} : vector<1x48x32xf32> to vector<1x32x32xf32>
    %14 = arith.addf %12, %13 : vector<1x32x32xf32>
    %15 = vector.extract_strided_slice %7 {offsets = [0, 10, 0], sizes = [1, 32, 32], strides = [1, 1, 1]} : vector<1x48x32xf32> to vector<1x32x32xf32>
    %16 = arith.addf %14, %15 : vector<1x32x32xf32>
    %cst = arith.constant 1.000000e-01 : f32
    %17 = vector.broadcast %cst : f32 to vector<1x32x32xf32>
    %18 = arith.mulf %16, %17 : vector<1x32x32xf32>
    %19 = vector.extract_strided_slice %7 {offsets = [0, 2, 0], sizes = [1, 32, 32], strides = [1, 1, 1]} : vector<1x48x32xf32> to vector<1x32x32xf32>
    %20 = arith.addf %16, %19 : vector<1x32x32xf32>
    %21 = vector.extract_strided_slice %7 {offsets = [0, 3, 0], sizes = [1, 32, 32], strides = [1, 1, 1]} : vector<1x48x32xf32> to vector<1x32x32xf32>
    %22 = arith.addf %20, %21 : vector<1x32x32xf32>
    %23 = vector.extract_strided_slice %7 {offsets = [0, 4, 0], sizes = [1, 32, 32], strides = [1, 1, 1]} : vector<1x48x32xf32> to vector<1x32x32xf32>
    %24 = arith.addf %22, %23 : vector<1x32x32xf32>
    %25 = vector.extract_strided_slice %7 {offsets = [0, 5, 0], sizes = [1, 32, 32], strides = [1, 1, 1]} : vector<1x48x32xf32> to vector<1x32x32xf32>
    %26 = arith.addf %24, %25 : vector<1x32x32xf32>
    %27 = vector.extract_strided_slice %7 {offsets = [0, 11, 0], sizes = [1, 32, 32], strides = [1, 1, 1]} : vector<1x48x32xf32> to vector<1x32x32xf32>
    %28 = arith.addf %26, %27 : vector<1x32x32xf32>
    %29 = vector.extract_strided_slice %7 {offsets = [0, 12, 0], sizes = [1, 32, 32], strides = [1, 1, 1]} : vector<1x48x32xf32> to vector<1x32x32xf32>
    %30 = arith.addf %28, %29 : vector<1x32x32xf32>
    %31 = vector.extract_strided_slice %7 {offsets = [0, 13, 0], sizes = [1, 32, 32], strides = [1, 1, 1]} : vector<1x48x32xf32> to vector<1x32x32xf32>
    %32 = arith.addf %30, %31 : vector<1x32x32xf32>
    %33 = vector.extract_strided_slice %7 {offsets = [0, 14, 0], sizes = [1, 32, 32], strides = [1, 1, 1]} : vector<1x48x32xf32> to vector<1x32x32xf32>
    %34 = arith.addf %32, %33 : vector<1x32x32xf32>
    %cst_2 = arith.constant 0.0384615399 : f32
    %35 = vector.broadcast %cst_2 : f32 to vector<1x32x32xf32>
    %36 = arith.mulf %34, %35 : vector<1x32x32xf32>
    %37 = arith.addf %18, %36 : vector<1x32x32xf32>
    %c0_3 = arith.constant 0 : index
    %c0_4 = arith.constant 0 : index
    %c0_5 = arith.constant 0 : index
    %38 = vector.load %arg4[%c0_3, %c0_4, %c0_5] : memref<1x32x32xf32, #tpu.memory_space<vmem>>, vector<1x32x32xf32>
    tpu.vector_store %arg4[%c0_3, %c0_4, %c0_5], %37 {strides = array<i32>} : memref<1x32x32xf32, #tpu.memory_space<vmem>>, vector<1x32x32xf32>,
    %c0_6 = arith.constant 0 : index
    %c0_7 = arith.constant 0 : index
    %c0_8 = arith.constant 0 : index
    %39 = vector.load %arg2[%c0_6, %c0_7, %c0_8] : memref<1x32x32xf32, #tpu.memory_space<vmem>>, vector<1x32x32xf32>
    %40 = arith.subf %39, %37 : vector<1x32x32xf32>
    %c0_9 = arith.constant 0 : index
    %c0_10 = arith.constant 0 : index
    %c0_11 = arith.constant 0 : index
    %41 = vector.load %arg3[%c0_9, %c0_10, %c0_11] : memref<1x32x32xf32, #tpu.memory_space<vmem>>, vector<1x32x32xf32>
    tpu.vector_store %arg3[%c0_9, %c0_10, %c0_11], %40 {strides = array<i32>} : memref<1x32x32xf32, #tpu.memory_space<vmem>>, vector<1x32x32xf32>,
    return
  }
  func.func @transform_0(%arg0: i32, %arg1: i32) -> (i32, i32, i32) {
    %c0_i32 = arith.constant 0 : i32
    %c0_i32_0 = arith.constant 0 : i32
    return %arg0, %c0_i32, %arg1 : i32, i32, i32
  }
  func.func @transform_1(%arg0: i32, %arg1: i32) -> (i32, i32, i32) {
    %c0_i32 = arith.constant 0 : i32
    %c0_i32_0 = arith.constant 0 : i32
    return %arg0, %c0_i32, %arg1 : i32, i32, i32
  }
  func.func @transform_2(%arg0: i32, %arg1: i32) -> (i32, i32, i32) {
    %c0_i32 = arith.constant 0 : i32
    %c0_i32_0 = arith.constant 0 : i32
    return %arg0, %c0_i32, %arg1 : i32, i32, i32
  }
}

</mosaic_0001>

<bundles_post_ra>
// kernel: tpu_custom_call.1
= control target key start
LH: loop header
LB: loop body
LE: loop exit
PB: predicated region body
PF: predicated region fallthrough
CT: control target
= control target key end

     0   :  { %8 = vsyncpa [#allocation3], 0  ;;  %s1231_s0 = inlined_call_operand.hbm [shape: f32[2,32,32], index: 0, kind: input, shape index: {}]   ;;  %s1232_s1 = inlined_call_operand.hbm [shape: f32[2,32,32], index: 1, kind: output, shape index: {0}]   ;;  %s1233_s2 = inlined_call_operand.hbm [shape: f32[2,32,32], index: 2, kind: output, shape index: {1}]  }
   0x1   :  { %10 = vsyncpa [#allocation3 + $0x1], 0 }
   0x2   :  { %11 = vsyncpa [#allocation4], 0 }
   0x3   :  { %13 = vsyncpa [#allocation4 + $0x1], 0 }
   0x4   :  { %14 = vsyncpa [#allocation7], 0 }
   0x5   :  { %16 = vsyncpa [#allocation7 + $0x1], 0  ;;  %s859_s9 = smov 0   ;;  %s861_s10 = smov 0  }
   0x6   :  { %s863_s11 = smov 0   ;;  %s865_s12 = smov 0  }
   0x7   :  { %s867_s13 = smov 0   ;;  %s869_s14 = smov 0  }
   0x8 LB: > { %s598_s15 = sadd.s32 4294967295, %s835_s14   ;;  %s599_s16 = sadd.s32 4294967294, %s835_s14   ;;  %s835_s14 = sphi %s869_s14, %s22_s14   ;;  %s831_s13 = sphi %s867_s13, %s1248_s13   ;;  %s827_s12 = sphi %s865_s12, %s1247_s12   ;;  %s823_s11 = sphi %s863_s11, %s1246_s11   ;;  %s819_s10 = sphi %s861_s10, %s1245_s10   ;;  %s815_s9 = sphi %s859_s9, %s1244_s9  }
   0x9   : > { %s34_s17 = sadd.s32 1, %s831_s13  ;;  %s43_s18 = sadd.s32 1, %s823_s11 }
   0xa   : > { %p36_p0 = scmp.ge.s32.totalorder %s34_s17, 2  ;;  %p50_p1 = scmp.ne.s32.totalorder %s823_s11, %s819_s10 }
   0xb   : > { %p51_p2 = scmp.eq.s32.totalorder %s835_s14, 0  ;;  %p56_p3 = scmp.ne.s32.totalorder %s819_s10, %s815_s9 }
   0xc   : > { %s1250_s17 = smov (%p36_p0, %s34_s17), 0  ;;  %p57_p5 = scmp.eq.s32.totalorder %s598_s15, 0 }
   0xd   : > { %p900_p4 = por %p51_p2, %p50_p1  ;;  %s38_s20 = ssub.s32 %s831_s13, %s1250_s17 }
   0xe   : > { %p82_p6 = scmp.eq.s32.totalorder %s598_s15, 1  ;;  %p41_p7 = scmp.eq.s32.totalorder %s38_s20, 0 }
   0xf   : > { %p906_p8 = por %p57_p5, %p56_p3  ;;  %p88_p10 = scmp.eq.s32.totalorder %s599_s16, 1 }
  0x10   : > { %p910_p9 = por %p82_p6, %p50_p1  ;;  %p637_p13 = scmp.lt.s32.totalorder %s835_s14, 2 }
  0x11   : > { %s915_s23 = scalar_select %p41_p7, %s823_s11, %s43_s18  }
  0x12   : > { %s1237_s22 = scalar_select %p910_p9, 1, 0 }
  0x13   : > { %p917_p11 = por %p88_p10, %p56_p3  ;;  %s136_s25 = sand.u32 1, %s823_s11  }
  0x14   : > { %s602_s26 = sshll.u32 %s136_s25, 5  ;;  %s617_s27 = sshll.u32 %s831_s13, 9 }
  0x15   : > { %s1238_s24 = scalar_select %p917_p11, 1, 0 }
  0x16   : > { %s928_s30 = scalar_lea.hbm %s1231_s0, %s617_s27  ;;  %s140_s3 = scalar_lea.vmem [#allocation2], %s602_s26 }
  0x17   : > { %s148_s4 = sshll.u32 %s140_s3, 4  ;;  %p934_p0 = pnand %p637_p13, %p900_p4  ;;  %s930_s4 = int_to_ptr.vmem [resolvable:$true] %s148_s4 }
  0x18   : > { %s939_s6 = scalar_lea.sflag [#allocation3], %s136_s25  ;;  %s691_s7 = scalar_lea.hbm %s928_s30, 512 }
  0x19   : > { %p692_p2 = scmp.ne.s32.totalorder %s928_s30, %s691_s7  ;;  %p693_p3 = pneg %p934_p0 }
  0x1a   : > { %s696_s16 = scalar_lea.hbm %s1231_s0, 1024  ;;  %p697_p4 = scmp.lt.u32.totalorder %s928_s30, %s1231_s0 }
  0x1b   : > { %p694_p5 = pnand %p693_p3, %p692_p2  ;;  %p698_p7 = scmp.lt.u32.totalorder %s696_s16, %s691_s7 }
  0x1c   : > { %p700_p13 = scmp.lt.u32.totalorder %s691_s7, %s928_s30 }
  0x1d   : > { %p695_p6 = pneg %p694_p5  ;;  %p699_p10 = por %p698_p7, %p697_p4 }
  0x1f   : > { %p701_p12 = por %p700_p13, %p699_p10 }
  0x21   : > { %p702_p1 = pnand %p701_p12, %p695_p6 }
  0x23   : > { %705 = shalt.err (!%p702_p1)
}
  0x24   : > { %s706_s20 = scalar_lea.vmem %s930_s4, 512  ;;  %s837_s25 = smov [#allocation2]  }
  0x25   : > { %p707_p2 = scmp.ne.s32.totalorder %s930_s4, %s706_s20  ;;  %s711_s26 = sshll.u32 %s837_s25, 4  ;;  %s712_s26 = int_to_ptr.vmem [resolvable:$false] %s711_s26 }
  0x26   : > { %s713_s27 = scalar_lea.vmem %s712_s26, 1024  ;;  %p714_p9 = scmp.lt.s32.totalorder %s930_s4, %s712_s26 }
  0x27   : > { %p709_p5 = pnand %p707_p2, %p693_p3  ;;  %p715_p4 = scmp.lt.s32.totalorder %s713_s27, %s706_s20 }
  0x29   : > { %p710_p11 = pneg %p709_p5  ;;  %p716_p7 = por %p715_p4, %p714_p9 }
  0x2b   : > { %p717_p10 = pnand %p716_p7, %p710_p11 }
  0x2d   : > { %720 = shalt.err (!%p717_p10)
}
  0x2e   : > { %s838_s28 = smov 128   ;;  %s839_s29 = smov 8  }
  0x2f   : > { %629 = dma.hbm_to_vmem [thread:$0]  (!%p934_p0), %s928_s30, 512, %s930_s4, %s939_s6, %s838_s28, %s838_s28, %s839_s29  }
  0x30   : > { %p156_p12 = scmp.lt.s32.totalorder %s835_s14, 3  ;;  %p1240_p1 = scmp.ge.s32.totalorder %s835_s14, 1 }
  0x32   : > { %p157_p3 = pnand %p1240_p1, %p156_p12 }
  0x33   : > { %s971_s3 = sand.u32 (!%p157_p3), 1, %s819_s10  }
  0x34   : > { %160 = sbr.rel (%p157_p3) target bundleno = 152 (0x98), region = 24  ;;  %s974_s7 = sshll.u32 (!%p157_p3), %s971_s3, 5 }
  0x35   : > { %s163_s8 = scalar_lea.sflag (!%p157_p3), [#allocation3], %s971_s3  ;;  %s978_s15 = scalar_lea.vmem (!%p157_p3), [#allocation2], %s974_s7 }
  0x3b   : > { %802 = dma.done.wait (%p906_p8), %s163_s8, 512  }
  0x3c   : > { %804 = vsyncadd (%p906_p8), %s163_s8, 4294966784  ;;  %v196_v0 = vlaneseq  ;;  %v988_v3 = vld [vmem:[%s978_s15] sm:$0xff]  ;;  %v995_v6 = vld [vmem:[%s978_s15 + $0x8] sm:$0xff]  ;;  %vm209_vm0 = vcmask 1046528   ;;  %vm229_vm1 = vcmask 1045504   ;;  %vm248_vm2 = vcmask 1044480  }
  0x3d   : > { %v211_v5 = vrot.slane %v988_v3, 1  ;;  %v230_v7 = vrot.slane %v988_v3, 2  ;;  %vm268_vm3 = vcmask 1043456   ;;  %vm302_vm4 = vcmask 1042432   ;;  %v1013_v20 = vld [vmem:[%s978_s15 + $0x10] sm:$0xff]  ;;  %v1043_v49 = vld [vmem:[%s978_s15 + $0x18] sm:$0xff] }
  0x3e   : > { %v984_v1 = vshrl.u32 %v196_v0, 7  ;;  %vm322_vm5 = vcmask 1041408   ;;  %v249_v9 = vrot.slane %v988_v3, 3  ;;  %v213_v10 = vrot.slane %v995_v6, 1  ;;  %s1092_s21 = scalar_lea.vmem [#allocation6], %s974_s7  ;;  %s1110_s30 = scalar_lea.vmem [#allocation5], %s974_s7 }
  0x3f   : > { %v231_v11 = vrot.slane %v995_v6, 2  ;;  %v250_v12 = vrot.slane %v995_v6, 3  ;;  %v269_v14 = vrot.slane %v988_v3, 4  ;;  %v1006_v15 = vrot.slane %v988_v3, 5  ;;  %s479_s4 = sshll.u32 %s1092_s21, 4  ;;  %s618_s5 = sshll.u32 %s827_s12, 9  ;;  %s1122_s4 = int_to_ptr.vmem [resolvable:$true] %s479_s4 }
  0x40   : > { %v198_v2 = vsub.s32 0, %v984_v1  ;;  %vm342_vm6 = vcmask 1040384   ;;  %v214_v17 = vsel %vm209_vm0, %v211_v5, %v213_v10  ;;  %v270_v19 = vrot.slane %v995_v6, 4  ;;  %s1132_s18 = scalar_lea.hbm %s1233_s2, %s618_s5  ;;  %s462_s19 = sshll.u32 %s1110_s30, 4  ;;  %s1168_s19 = int_to_ptr.vmem [resolvable:$true] %s462_s19 }
  0x41   : > { %v232_v18 = vsel %vm229_vm1, %v230_v7, %v231_v11  ;;  %v1017_v22 = vrot.slane %v988_v3, 6  ;;  %v1020_v23 = vrot.slane %v988_v3, 7  ;;  %v225_v24 = vadd.f32 %v214_v17, %v988_v3  ;;  %s448_s20 = scalar_lea.sflag [#allocation7], %s971_s3  ;;  %s721_s25 = scalar_lea.vmem %s1122_s4, 512 }
  0x42   : > { %v991_v4 = vrot.slane %v988_v3, %v198_v2  ;;  %v251_v28 = vsel %vm248_vm2, %v249_v9, %v250_v12  ;;  %v215_v31 = vrot.slane %v1013_v20, 1  ;;  %v233_v32 = vrot.slane %v1013_v20, 2  ;;  %p722_p8 = scmp.ne.s32.totalorder %s1122_s4, %s721_s25  ;;  %p1241_p9 = scmp.ne.s32.totalorder %s1237_s22, 0 }
  0x43   : > { %v243_v30 = vadd.f32 %v232_v18, %v225_v24  ;;  %v271_v34 = vsel %vm268_vm3, %v269_v14, %v270_v19  ;;  %v306_v35 = vrot.slane %v995_v6, 5  ;;  %v252_v36 = vrot.slane %v1013_v20, 3  ;;  %s840_s26 = smov [#allocation6]  }
  0x44   : > { %v210_v8 = vrot.slane %v991_v4, 1  ;;  %v293_v21 = vrot.slane %v991_v4, 4  ;;  %v303_v26 = vrot.slane %v991_v4, 5  ;;  %v323_v27 = vrot.slane %v991_v4, 6  ;;  %p723_p11 = pnand %p722_p8, %p1241_p9  ;;  %s725_s27 = sshll.u32 %s840_s26, 4  ;;  %s726_s27 = int_to_ptr.vmem [resolvable:$false] %s725_s27 }
  0x45   : > { %v343_v29 = vrot.slane %v991_v4, 7  ;;  %v264_v37 = vadd.f32 %v251_v28, %v243_v30  ;;  %v216_v38 = vsel %vm209_vm0, %v213_v10, %v215_v31  ;;  %v234_v39 = vsel %vm229_vm1, %v231_v11, %v233_v32  ;;  %s727_s28 = scalar_lea.vmem %s726_s27, 1024  ;;  %p728_p6 = scmp.lt.s32.totalorder %s1122_s4, %s726_s27 }
  0x46   : > { %v212_v13 = vsel %vm209_vm0, %v210_v8, %v211_v5  ;;  %v272_v40 = vrot.slane %v1013_v20, 4  ;;  %v294_v42 = vsel %vm268_vm3, %v293_v21, %v269_v14  ;;  %v226_v43 = vadd.f32 %v216_v38, %v995_v6  ;;  %p724_p0 = pneg %p723_p11  ;;  %p729_p13 = scmp.lt.s32.totalorder %s727_s28, %s721_s25 }
  0x47   : > { %v224_v16 = vadd.f32 %v212_v13, %v991_v4  ;;  %v202_v44 = vsub.s32 7, %v984_v1  ;;  %v284_v45 = vadd.f32 %v271_v34, %v264_v37  ;;  %v305_v46 = vsel %vm302_vm4, %v303_v26, %v1006_v15 }
  0x48   : > { %v326_v47 = vrot.slane %v995_v6, 6  ;;  %v253_v48 = vsel %vm248_vm2, %v250_v12, %v252_v36  ;;  %v325_v51 = vsel %vm322_vm5, %v323_v27, %v1017_v22  ;;  %v345_v52 = vsel %vm342_vm6, %v343_v29, %v1020_v23  ;;  %p730_p2 = por %p729_p13, %p728_p6 }
  0x49   : > { %v242_v25 = vadd.f32 %v230_v7, %v224_v16  ;;  %v244_v53 = vadd.f32 %v234_v39, %v226_v43  ;;  %v298_v54 = vadd.f32 %v294_v42, %v284_v45  ;;  %v307_v55 = vsel %vm302_vm4, %v1006_v15, %v306_v35 }
  0x4a   : > { %v346_v56 = vrot.slane %v995_v6, 7  ;;  %v273_v57 = vsel %vm268_vm3, %v270_v19, %v272_v40  ;;  %v217_v60 = vrot.slane %v1043_v49, 1  ;;  %v235_v61 = vrot.slane %v1043_v49, 2  ;;  %p731_p5 = pnand %p730_p2, %p724_p0 }
  0x4b   : > { %v263_v33 = vadd.f32 %v249_v9, %v242_v25  ;;  %v265_v59 = vadd.f32 %v253_v48, %v244_v53  ;;  %v318_v62 = vadd.f32 %v305_v46, %v298_v54  ;;  %v327_v63 = vsel %vm322_vm5, %v1017_v22, %v326_v47 }
  0x4c   : > { %v254_v0 = vrot.slane %v1043_v49, 3  ;;  %v274_v1 = vrot.slane %v1043_v49, 4  ;;  %v218_v5 = vsel %vm209_vm0, %v215_v31, %v217_v60  ;;  %v236_v7 = vsel %vm229_vm1, %v233_v32, %v235_v61 }
  0x4d   : > { %v283_v41 = vadd.f32 %v269_v14, %v263_v33  ;;  %v285_v4 = vadd.f32 %v273_v57, %v265_v59  ;;  %v338_v8 = vadd.f32 %v325_v51, %v318_v62  ;;  %v347_v9 = vsel %vm342_vm6, %v1020_v23, %v346_v56 }
  0x4e   : > { %v308_v10 = vrot.slane %v1013_v20, 5  ;;  %v227_v11 = vadd.f32 %v218_v5, %v1013_v20  ;;  %v328_v14 = vrot.slane %v1013_v20, 6  ;;  %v255_v16 = vsel %vm248_vm2, %v252_v36, %v254_v0 }
  0x4f   : > { %v297_v50 = vadd.f32 %v293_v21, %v283_v41  ;;  %v299_v13 = vadd.f32 %v285_v4, %v271_v34  ;;  %v358_v17 = vadd.f32 %v345_v52, %v338_v8  ;;  %v348_v18 = vrot.slane %v1013_v20, 7 }
  0x50   : > { %v245_v19 = vadd.f32 %v236_v7, %v227_v11  ;;  %v275_v21 = vsel %vm268_vm3, %v272_v40, %v274_v1  ;;  %v288_v28 = vmul.f32 0.1, %v283_v41  ;;  %vm404_vm7 = vcmask 261126  }
  0x51   : > { %v317_v58 = vadd.f32 %v303_v26, %v297_v50  ;;  %v319_v25 = vadd.f32 %v307_v55, %v299_v13  ;;  %v1071_v26 = vrot.slane %v1043_v49, %v202_v44  ;;  %v309_v30 = vsel %vm302_vm4, %v306_v35, %v308_v10 }
  0x52   : > { %v266_v31 = vadd.f32 %v255_v16, %v245_v19  ;;  %v289_v37 = vmul.f32 0.1, %v284_v45  ;;  %v310_v41 = vrot.slane %v1043_v49, 5  ;;  %v329_v44 = vsel %vm322_vm5, %v326_v47, %v328_v14 }
  0x53   : > { %v337_v2 = vadd.f32 %v323_v27, %v317_v58  ;;  %v228_v27 = vadd.f32 %v217_v60, %v1043_v49  ;;  %v339_v33 = vadd.f32 %v327_v63, %v319_v25  ;;  %v256_v36 = vrot.slane %v1071_v26, 3 }
  0x54   : > { %v286_v38 = vadd.f32 %v275_v21, %v266_v31  ;;  %v276_v39 = vrot.slane %v1071_v26, 4  ;;  %v330_v45 = vrot.slane %v1043_v49, 6  ;;  %v311_v47 = vsel %vm302_vm4, %v308_v10, %v310_v41 }
  0x55   : > { %v357_v12 = vadd.f32 %v343_v29, %v337_v2  ;;  %v367_v29 = vadd.f32 %v358_v17, %v307_v55  ;;  %v246_v34 = vadd.f32 %v235_v61, %v228_v27  ;;  %v359_v42 = vadd.f32 %v347_v9, %v339_v33 }
  0x56   : > { %v257_v43 = vsel %vm248_vm2, %v254_v0, %v256_v36  ;;  %v277_v51 = vsel %vm268_vm3, %v274_v1, %v276_v39  ;;  %vm406_vm8 = vcmask 261120   ;;  %v331_v0 = vsel %vm322_vm5, %v328_v14, %v330_v45 }
  0x57   : > { %v366_v24 = vadd.f32 %v357_v12, %v1006_v15  ;;  %v376_v15 = vadd.f32 %v367_v29, %v327_v63  ;;  %v267_v46 = vadd.f32 %v257_v43, %v246_v34  ;;  %v368_v50 = vadd.f32 %v359_v42, %v309_v30 }
  0x58   : > { %v362_v1 = vrot.slane %v1071_v26, 5  ;;  %v290_v2 = vmul.f32 0.1, %v285_v4  ;;  %v371_v11 = vrot.slane %v1071_v26, 6  ;;  %v380_v17 = vrot.slane %v1071_v26, 7 }
  0x59   : > { %v375_v32 = vadd.f32 %v366_v24, %v1017_v22  ;;  %v385_v35 = vadd.f32 %v376_v15, %v347_v9  ;;  %v300_v22 = vadd.f32 %v286_v38, %v273_v57  ;;  %v287_v54 = vadd.f32 %v277_v51, %v267_v46 }
  0x5a   : > { %v377_v58 = vadd.f32 %v368_v50, %v329_v44  ;;  %v350_v57 = vrot.slane %v1043_v49, 7  ;;  %v363_v16 = vsel %vm302_vm4, %v310_v41, %v362_v1  ;;  %vm410_vm9 = vcmask 259072  }
  0x5b   : > { %v384_v40 = vadd.f32 %v375_v32, %v1020_v23  ;;  %v390_v52 = vadd.f32 %v385_v35, %v995_v6  ;;  %v349_v23 = vsel %vm342_vm6, %v346_v56, %v348_v18  ;;  %v320_v53 = vadd.f32 %v309_v30, %v300_v22 }
  0x5c   : > { %v301_v61 = vadd.f32 %v287_v54, %v275_v21  ;;  %v386_v63 = vadd.f32 %v377_v58, %v349_v23  ;;  %v351_v10 = vsel %vm342_vm6, %v348_v18, %v350_v57  ;;  %v372_v18 = vsel %vm322_vm5, %v330_v45, %v371_v11 }
  0x5d   : > { %v389_v48 = vadd.f32 %v384_v40, %v988_v3  ;;  %v395_v59 = vmul.f32 0.03846154, %v390_v52  ;;  %v340_v60 = vadd.f32 %v329_v44, %v320_v53  ;;  %v381_v31 = vsel %vm342_vm6, %v350_v57, %v380_v17 }
  0x5e   : > { %v321_v7 = vadd.f32 %v311_v47, %v301_v61  ;;  %v391_v9 = vadd.f32 %v386_v63, %v1013_v20  ;;  %v291_v32 = vmul.f32 0.1, %v286_v38  ;;  %v292_v40 = vmul.f32 0.1, %v287_v54 }
  0x5f   : > { %v394_v55 = vmul.f32 0.03846154, %v389_v48  ;;  %v400_v56 = vadd.f32 %v395_v59, %v289_v37  ;;  %v360_v5 = vadd.f32 %v349_v23, %v340_v60 }
  0x60   : > { %v341_v13 = vadd.f32 %v331_v0, %v321_v7  ;;  %v396_v14 = vmul.f32 0.03846154, %v391_v9 }
  0x61   : > { %v399_v62 = vadd.f32 %v394_v55, %v288_v28  ;;  %407 = vst.msk [vmem:[%s1092_s21 + $0x2] sm:$0xff] %vm406_vm8, %v400_v56  ;;  %v422_v12 = vrot.slane %v400_v56, 6  ;;  %v369_v4 = vadd.f32 %v360_v5, %v311_v47 }
  0x62   : > { %v361_v21 = vadd.f32 %v351_v10, %v341_v13  ;;  %v401_v25 = vadd.f32 %v396_v14, %v290_v2 }
  0x63   : > { %405 = vst.msk [vmem:[%s1092_s21 - $0x6] sm:$0xc0] %vm404_vm7, %v399_v62  ;;  %v421_v8 = vrot.slane %v399_v62, 6  ;;  %v378_v19 = vadd.f32 %v369_v4, %v331_v0 }
  0x64   : > { %v370_v29 = vadd.f32 %v363_v16, %v361_v21  ;;  %408 = vst.msk [vmem:[%s1092_s21 + $0xa] sm:$0xff] %vm406_vm8, %v401_v25  ;;  %v424_v30 = vrot.slane %v401_v25, 6 }
  0x65   : > { %v423_v24 = vsel %vm322_vm5, %v421_v8, %v422_v12  ;;  %v387_v28 = vadd.f32 %v378_v19, %v351_v10 }
  0x66   : > { %v434_v27 = vsub.f32 %v988_v3, %v423_v24  ;;  %v379_v34 = vadd.f32 %v372_v18, %v370_v29  ;;  %v425_v3 = vsel %vm322_vm5, %v422_v12, %v424_v30 }
  0x67   : > { %v392_v33 = vadd.f32 %v387_v28, %v1043_v49  ;;  %v435_v15 = vsub.f32 %v995_v6, %v425_v3 }
  0x68   : > { %438 = vst.msk [vmem:[%s1110_s30] sm:$0xff] %vm406_vm8, %v434_v27  ;;  %v388_v37 = vadd.f32 %v381_v31, %v379_v34 }
  0x69   : > { %v397_v36 = vmul.f32 0.03846154, %v392_v33  ;;  %439 = vst.msk [vmem:[%s1110_s30 + $0x8] sm:$0xff] %vm406_vm8, %v435_v15 }
  0x6a   : > { %v393_v42 = vadd.f32 %v388_v37, %v1071_v26 }
  0x6b   : > { %v402_v39 = vadd.f32 %v397_v36, %v291_v32 }
  0x6c   : > { %v398_v6 = vmul.f32 0.03846154, %v393_v42 }
  0x6d   : > { %409 = vst.msk [vmem:[%s1092_s21 + $0x12] sm:$0xff] %vm406_vm8, %v402_v39  ;;  %v426_v38 = vrot.slane %v402_v39, 6 }
  0x6e   : > { %v403_v41 = vadd.f32 %v398_v6, %v292_v40 }
  0x6f   : > { %v427_v43 = vsel %vm322_vm5, %v424_v30, %v426_v38 }
  0x70   : > { %v436_v26 = vsub.f32 %v1013_v20, %v427_v43  ;;  %411 = vst.msk [vmem:[%s1092_s21 + $0x1a] sm:$0x3f] %vm410_vm9, %v403_v41  ;;  %v428_v35 = vrot.slane %v403_v41, 6 }
  0x72   : > { %440 = vst.msk [vmem:[%s1110_s30 + $0x10] sm:$0xff] %vm406_vm8, %v436_v26 }
  0x73   : > { %734 = shalt.err (!%p731_p5)
}
  0x74   : > { %s735_s29 = scalar_lea.hbm %s1132_s18, 512  ;;  %s739_s15 = scalar_lea.hbm %s1233_s2, 1024 }
  0x75   : > { %p736_p4 = scmp.ne.s32.totalorder %s1132_s18, %s735_s29  ;;  %p740_p12 = scmp.lt.u32.totalorder %s1132_s18, %s1233_s2 }
  0x76   : > { %p741_p1 = scmp.lt.u32.totalorder %s739_s15, %s735_s29  ;;  %p743_p8 = scmp.lt.u32.totalorder %s735_s29, %s1132_s18 }
  0x77   : > { %p737_p7 = pnand %p736_p4, %p1241_p9 }
  0x78   : > { %p742_p3 = por %p741_p1, %p740_p12 }
  0x79   : > { %p738_p10 = pneg %p737_p7 }
  0x7a   : > { %p744_p11 = por %p743_p8, %p742_p3 }
  0x7c   : > { %p745_p0 = pnand %p744_p11, %p738_p10 }
  0x7e   : > { %748 = shalt.err (!%p745_p0)
}
  0x7f   : > { %s841_s16 = smov 128   ;;  %s842_s25 = smov 8   ;;  %v429_v20 = vsel %vm322_vm5, %v426_v38, %v428_v35 }
  0x80   : > { %623 = dma.vmem_to_hbm [thread:$0]  (%p1241_p9), %s1122_s4, 512, %s1132_s18, %s448_s20, %s841_s16, %s841_s16, %s842_s25   ;;  %v437_v44 = vsub.f32 %v1043_v49, %v429_v20 }
  0x81   : > { %s1177_s28 = scalar_lea.hbm %s1232_s1, %s618_s5  ;;  %s443_s29 = scalar_lea.sflag [#allocation4], %s971_s3 }
  0x82   : > { %441 = vst.msk [vmem:[%s1110_s30 + $0x18] sm:$0xff] %vm406_vm8, %v437_v44  ;;  %s749_s4 = scalar_lea.vmem %s1168_s19, 512  ;;  %s843_s18 = smov [#allocation5]  }
  0x83   : > { %p750_p6 = scmp.ne.s32.totalorder %s1168_s19, %s749_s4  ;;  %s753_s20 = sshll.u32 %s843_s18, 4  ;;  %s754_s20 = int_to_ptr.vmem [resolvable:$false] %s753_s20 }
  0x84   : > { %s755_s7 = scalar_lea.vmem %s754_s20, 1024  ;;  %p756_p5 = scmp.lt.s32.totalorder %s1168_s19, %s754_s20 }
  0x85   : > { %p751_p13 = pnand %p750_p6, %p1241_p9  ;;  %p757_p4 = scmp.lt.s32.totalorder %s755_s7, %s749_s4 }
  0x87   : > { %p752_p2 = pneg %p751_p13  ;;  %p758_p7 = por %p757_p4, %p756_p5 }
  0x89   : > { %p759_p10 = pnand %p758_p7, %p752_p2 }
  0x8b   : > { %762 = shalt.err (!%p759_p10)
}
  0x8c   : > { %s763_s12 = scalar_lea.hbm %s1177_s28, 512  ;;  %s767_s8 = scalar_lea.hbm %s1232_s1, 1024 }
  0x8d   : > { %p764_p12 = scmp.ne.s32.totalorder %s1177_s28, %s763_s12  ;;  %p768_p8 = scmp.lt.u32.totalorder %s1177_s28, %s1232_s1 }
  0x8e   : > { %p769_p11 = scmp.lt.u32.totalorder %s767_s8, %s763_s12  ;;  %p771_p6 = scmp.lt.u32.totalorder %s763_s12, %s1177_s28 }
  0x8f   : > { %p765_p1 = pnand %p764_p12, %p1241_p9 }
  0x90   : > { %p770_p0 = por %p769_p11, %p768_p8 }
  0x91   : > { %p766_p3 = pneg %p765_p1 }
  0x92   : > { %p772_p13 = por %p771_p6, %p770_p0 }
  0x94   : > { %p773_p2 = pnand %p772_p13, %p766_p3 }
  0x96   : > { %776 = shalt.err (!%p773_p2)
}
  0x97   : > { %622 = dma.vmem_to_hbm [thread:$0]  (%p1241_p9), %s1168_s19, 512, %s1177_s28, %s443_s29, %s841_s16, %s841_s16, %s842_s25  }
  0x98 PF: > { %s494_s6 = sand.u32 1, %s815_s9   ;;  %p1242_p5 = scmp.ne.s32.totalorder %s1238_s24, 0 }
  0x99   : > { %p1243_p4 = scmp.ge.s32.totalorder %s835_s14, 2  ;;  %s495_s26 = scalar_lea.sflag [#allocation4], %s494_s6 }
  0x9b   : > { %p631_p7 = pnand %p1243_p4, %p1242_p5 }
  0x9d   : > { %806 = dma.done.wait (!%p631_p7), %s495_s26, 512  }
  0x9e   : > { %808 = vsyncadd (!%p631_p7), %s495_s26, 4294966784  ;;  %s504_s22 = scalar_lea.sflag [#allocation7], %s494_s6 }
  0x9f   : > { %810 = dma.done.wait (!%p631_p7), %s504_s22, 512  }
  0xa0   : > { %812 = vsyncadd (!%p631_p7), %s504_s22, 4294966784  ;;  %s22_s14 = sadd.s32 1, %s835_s14   ;;  %s1244_s9 = smov %s819_s10 }
  0xa1   : > { %p19_p10 = scmp.ge.s32.totalorder %s22_s14, 4   ;;  %s1245_s10 = smov %s823_s11 }
  0xa2   : > { %s1246_s11 = smov %s915_s23  ;;  %s1247_s12 = smov %s831_s13 }
  0xa3   : > { %s1248_s13 = smov %s1250_s17  ;;  %21 = sbr.rel (!%p19_p10) target bundleno = 8 (0x8), region = 86 }
  0xaa   :  { %509 = vsyncpa [#allocation3], 1 }
  0xab   :  { %511 = vsyncpa [#allocation3 + $0x1], 1 }
  0xac   :  { %512 = vsyncpa [#allocation4], 1 }
  0xad   :  { %514 = vsyncpa [#allocation4 + $0x1], 1 }
  0xae   :  { %515 = vsyncpa [#allocation7], 1 }
  0xaf   :  { %517 = vsyncpa [#allocation7 + $0x1], 1 }

</bundles_post_ra>
